<compile_context>
chip_gen: v7x
topology: tpu7x:2x2x1
jax: 0.10.0
libtpu: 0.0.40
codegen_flags: <defaults>
</compile_context>

<pallas_src>
import jax
import jax.numpy as jnp
from jax import lax
from jax.experimental import pallas as pl
from jax.experimental.pallas import tpu as pltpu

_LANE = 128
_CORE_SPLIT = 2  # leading "parallel" grid axis -> 2 TensorCores on v7x


def _round_up(x, m):
    return ((x + m - 1) // m) * m


def _flatten_lane_dense(x, row_multiple=1):
    """Flatten `x` to a lane-dense (rows, 128) slab in its NATIVE dtype.

    Pads only up to `row_multiple` rows of 128 lanes (zeros contribute nothing
    to the |diff| / x^2 sums).  For typical image sizes n % 128 == 0, so no
    copy is materialized at all.
    """
    flat = x.reshape(-1)
    n = flat.shape[0]
    rows = _round_up(-(-n // _LANE), row_multiple)
    padded = rows * _LANE
    if padded != n:
        flat = jnp.pad(flat, (0, padded - n))
    return flat.reshape(rows, _LANE)


def _pick_block_rows(total_rows, requested, itemsize):
    if requested is None:
        # ~2 MiB per DMA buffer: 4096 rows f32 / 8192 rows bf16.
        requested = (2 * 1024 * 1024) // (_LANE * itemsize)
    requested = max(8, (int(requested) // 8) * 8)
    if requested >= total_rows:
        # Single step per core: keep the block inside the slab when possible
        # (any remaining oversize tail rows are masked in-kernel).
        return max(8, min(requested, (max(total_rows, 8) // 8) * 8))
    if requested >= 32:
        return (requested // 32) * 32  # multiple of 32 -> wider accumulator fold
    return requested


def _make_kernel(block_rows, acc_rows, total_rows, steps_per_core):
    n_groups = block_rows // acc_rows

    def kernel(rend_ref,    # VMEM (block_rows, 128) rendered image tile (native dtype)
               gt_ref,      # VMEM (block_rows, 128) ground-truth image tile
               plmk_ref,    # VMEM (rl, 128) f32 predicted landmarks (resident)
               glmk_ref,    # VMEM (rl, 128) f32 gt landmarks (resident)
               shape_ref,   # VMEM (rs, 128) f32 shape coeffs (resident)
               expr_ref,    # VMEM (re, 128) f32 expression coeffs (resident)
               out_ref,     # VMEM (1, 8, 128) f32 per-core raw sums
               acc_ref):    # VMEM (acc_rows, 128) f32 pixel partial-sum accumulator
        c = pl.program_id(0)   # TensorCore split ("parallel")
        i = pl.program_id(1)   # row-tile step ("arbitrary")

        @pl.when(i == 0)
        def _():
            acc_ref[...] = jnp.zeros_like(acc_ref)

        # |rend - gt| in the NATIVE dtype (bf16 stays packed on the VPU on
        # v6e/v7x); upcast to f32 only for the accumulate.
        a = jnp.abs(rend_ref[...] - gt_ref[...]).astype(jnp.float32)

        # Rows of this tile that actually exist in the image slab; rows past
        # `limit` (ragged tail / phantom core-1 step) are stale VMEM -> mask.
        start_row = (c * steps_per_core + i) * block_rows
        limit = total_rows - start_row

        @pl.when(limit >= block_rows)        # common path: full tile, no masking
        def _():
            acc_ref[...] += jnp.sum(a.reshape(n_groups, acc_rows, _LANE), axis=0)

        @pl.when(limit < block_rows)         # last / phantom tile: mask the tail
        def _():
            row_ids = lax.broadcasted_iota(jnp.int32, (block_rows, _LANE), 0)
            masked = jnp.where(row_ids < limit, a, 0.0)
            acc_ref[...] += jnp.sum(masked.reshape(n_groups, acc_rows, _LANE),
                                    axis=0)

        # Per-core epilogue: one cross-lane reduction + the tiny resident
        # tensors (reduced on core 0 only so the wrapper sum is not doubled).
        @pl.when(i == steps_per_core - 1)
        def _():
            pix = jnp.sum(acc_ref[...])
            only0 = jnp.where(c == 0, jnp.float32(1.0), jnp.float32(0.0))
            d = plmk_ref[...] - glmk_ref[...]
            lmk = jnp.sum(d * d) * only0
            s = shape_ref[...]
            shp = jnp.sum(s * s) * only0
            e = expr_ref[...]
            epr = jnp.sum(e * e) * only0
            rows = lax.broadcasted_iota(jnp.int32, (8, _LANE), 0)
            out_ref[0] = (jnp.where(rows == 0, pix, 0.0)
                          + jnp.where(rows == 1, lmk, 0.0)
                          + jnp.where(rows == 2, shp, 0.0)
                          + jnp.where(rows == 3, epr, 0.0))

    return kernel


def total_loss(pred_coeffs, pred_verts, pred_landmarks_2d, rendered_image,
               gt_image, gt_landmarks_2d, loss_weights, *, block_rows=None):
    """Mirror of TotalLoss.forward. Returns (total_loss, loss_dict)."""
    del pred_verts  # unused by the reference forward pass
    if rendered_image.shape != gt_image.shape:
        raise ValueError("rendered_image and gt_image must have identical shapes")

    f32 = jnp.float32

    n_pixel = int(rendered_image.size)
    n_lmk = int(pred_landmarks_2d.size)

    shape_c = pred_coeffs.get('shape', None)
    expr_c = pred_coeffs.get('expression', None)
    shape_c = jnp.zeros((1,), f32) if shape_c is None else shape_c.astype(f32)
    expr_c = jnp.zeros((1,), f32) if expr_c is None else expr_c.astype(f32)
    n_shape = int(shape_c.size)
    n_expr = int(expr_c.size)

    # Image slabs: native dtype, lane-dense (rows, 128); pad only to a lane
    # multiple, tail tiles are masked in-kernel (no full-image pad copy).
    rend2d = _flatten_lane_dense(rendered_image)
    gt2d = _flatten_lane_dense(gt_image)
    total_rows = rend2d.shape[0]

    block_rows = _pick_block_rows(total_rows, block_rows,
                                  jnp.dtype(rendered_image.dtype).itemsize)
    acc_rows = 32 if block_rows % 32 == 0 else 8

    total_steps = -(-total_rows // block_rows)
    steps_per_core = -(-total_steps // _CORE_SPLIT)

    # Small tensors: one resident lane-dense f32 block each (DMA'd once, used
    # only in the epilogue).
    plmk2d = _flatten_lane_dense(pred_landmarks_2d.astype(f32), row_multiple=8)
    glmk2d = _flatten_lane_dense(gt_landmarks_2d.astype(f32), row_multiple=8)
    shape2d = _flatten_lane_dense(shape_c, row_multiple=8)
    expr2d = _flatten_lane_dense(expr_c, row_multiple=8)

    def img_map(c, i):
        # Clamp phantom steps (uneven core split) to the last real block; they
        # are fully masked in-kernel.
        return (jnp.minimum(c * steps_per_core + i, total_steps - 1), 0)

    img_spec = pl.BlockSpec((block_rows, _LANE), img_map)

    def _resident(arr):
        return pl.BlockSpec(arr.shape, lambda c, i: (0, 0))

    kernel = _make_kernel(block_rows, acc_rows, total_rows, steps_per_core)

    out = pl.pallas_call(
        kernel,
        out_shape=jax.ShapeDtypeStruct((_CORE_SPLIT, 8, _LANE), f32),
        grid_spec=pltpu.PrefetchScalarGridSpec(
            num_scalar_prefetch=0,
            grid=(_CORE_SPLIT, steps_per_core),
            in_specs=[
                img_spec,               # rendered image tiles
                img_spec,               # ground-truth image tiles
                _resident(plmk2d),      # predicted landmarks
                _resident(glmk2d),      # gt landmarks
                _resident(shape2d),     # shape coeffs
                _resident(expr2d),      # expression coeffs
            ],
            out_specs=pl.BlockSpec((1, 8, _LANE), lambda c, i: (c, 0, 0)),
            scratch_shapes=[pltpu.VMEM((acc_rows, _LANE), f32)]),
        compiler_params=pltpu.CompilerParams(
            dimension_semantics=("parallel", "arbitrary"),
            vmem_limit_bytes=48 * 1024 * 1024),
    )(rend2d, gt2d, plmk2d, glmk2d, shape2d, expr2d)

    # Combine the two per-core partial sums and apply (traced) weights here, so
    # weight-schedule changes never trigger a Mosaic recompile.
    sums = out[:, :, 0].sum(axis=0)  # [pix_l1, lmk_sq, shape_sq, expr_sq, ...]
    loss_pixel = sums[0] / n_pixel
    loss_landmark = sums[1] / n_lmk
    loss_reg_shape = sums[2] / n_shape
    loss_reg_expr = sums[3] / n_expr

    total = (loss_weights.get('pixel', 1.0) * loss_pixel
             + loss_weights.get('landmark', 1.0) * loss_landmark
             + loss_weights.get('reg_shape', 1.0) * loss_reg_shape
             + loss_weights.get('reg_expression', 1.0) * loss_reg_expr)

    loss_dict = {
        'total': total,
        'pixel': loss_pixel,
        'landmark': loss_landmark,
        'reg_shape': loss_reg_shape,
        'reg_expression': loss_reg_expr,
    }
    if 'perceptual' in loss_weights and loss_weights['perceptual'] > 0:
        # TODO(synk): perceptual loss is a constant 0.0 in the reference forward
        # (no VGG features are computed); kept as a plain zero here.
        loss_dict['perceptual'] = jnp.float32(0.0)
    return total, loss_dict


def _reference(pred_coeffs, pred_landmarks_2d, rendered_image, gt_image,
               gt_landmarks_2d, loss_weights):
    """Pure-JAX reference (abs-diff in the images' native dtype, f32 reduce)."""
    lp = jnp.mean(jnp.abs(rendered_image - gt_image).astype(jnp.float32))
    ll = jnp.mean((pred_landmarks_2d.astype(jnp.float32)
                   - gt_landmarks_2d.astype(jnp.float32)) ** 2)
    ls = jnp.mean(pred_coeffs['shape'].astype(jnp.float32) ** 2)
    le = jnp.mean(pred_coeffs['expression'].astype(jnp.float32) ** 2)
    total = (loss_weights.get('pixel', 1.0) * lp
             + loss_weights.get('landmark', 1.0) * ll
             + loss_weights.get('reg_shape', 1.0) * ls
             + loss_weights.get('reg_expression', 1.0) * le)
    return total, {'pixel': lp, 'landmark': ll, 'reg_shape': ls,
                   'reg_expression': le}


if __name__ == "__main__":
    key = jax.random.PRNGKey(0)
    kr, kg, kpl, kgl, ks, ke, kv = jax.random.split(key, 7)

    B, C, H, W = 2, 3, 64, 64          # NCHW images
    n_lmk, n_shape, n_expr, n_verts = 68, 100, 50, 128

    rendered_image = jax.random.uniform(kr, (B, C, H, W), jnp.float32)
    gt_image = jax.random.uniform(kg, (B, C, H, W), jnp.float32)
    pred_landmarks_2d = jax.random.normal(kpl, (B, n_lmk, 2), jnp.float32)
    gt_landmarks_2d = jax.random.normal(kgl, (B, n_lmk, 2), jnp.float32)
    pred_coeffs = {
        'shape': jax.random.normal(ks, (B, n_shape), jnp.float32) * 0.1,
        'expression': jax.random.normal(ke, (B, n_expr), jnp.float32) * 0.1,
    }
    pred_verts = jax.random.normal(kv, (B, n_verts, 3), jnp.float32)

    loss_weights = {'pixel': 1.0, 'landmark': 0.001,
                    'reg_shape': 1e-4, 'reg_expression': 1e-4}

    def _check(total, loss_dict, ref_total, ref_parts, rtol, atol, tag):
        assert jnp.allclose(total, ref_total, rtol=rtol, atol=atol), (
            tag, total, ref_total)
        for k in ('pixel', 'landmark', 'reg_shape', 'reg_expression'):
            assert jnp.allclose(loss_dict[k], ref_parts[k], rtol=rtol, atol=atol), (
                tag, k, loss_dict[k], ref_parts[k])

    # 1) f32, default (large) tile: single step on core-slot 0, fully-masked
    #    phantom step on core-slot 1.
    total, loss_dict = total_loss(pred_coeffs, pred_verts, pred_landmarks_2d,
                                  rendered_image, gt_image, gt_landmarks_2d,
                                  loss_weights)
    total = jax.block_until_ready(total)
    ref_total, ref_parts = _reference(pred_coeffs, pred_landmarks_2d,
                                      rendered_image, gt_image, gt_landmarks_2d,
                                      loss_weights)
    _check(total, loss_dict, ref_total, ref_parts, 1e-5, 1e-6, "f32/default")

    # 2) f32, small explicit tile: multi-step accumulation on both core-slots.
    total2, ld2 = total_loss(pred_coeffs, pred_verts, pred_landmarks_2d,
                             rendered_image, gt_image, gt_landmarks_2d,
                             loss_weights, block_rows=64)
    total2 = jax.block_until_ready(total2)
    _check(total2, ld2, ref_total, ref_parts, 1e-5, 1e-6, "f32/block64")

    # 3) f32, ragged pixel count (not a multiple of 128): exercises the
    #    in-kernel tail-row mask on a partial edge block.
    Hr = Wr = 50
    kr2, kg2 = jax.random.split(kr)
    rend_r = jax.random.uniform(kr2, (B, C, Hr, Wr), jnp.float32)
    gt_r = jax.random.uniform(kg2, (B, C, Hr, Wr), jnp.float32)
    total3, ld3 = total_loss(pred_coeffs, pred_verts, pred_landmarks_2d,
                             rend_r, gt_r, gt_landmarks_2d, loss_weights)
    total3 = jax.block_until_ready(total3)
    ref_total3, ref_parts3 = _reference(pred_coeffs, pred_landmarks_2d,
                                        rend_r, gt_r, gt_landmarks_2d,
                                        loss_weights)
    _check(total3, ld3, ref_total3, ref_parts3, 1e-5, 1e-6, "f32/ragged")

    # 4) bf16 image transport (half the HBM bytes): sub/abs stay in bf16 on
    #    the VPU, accumulation in f32.
    rend_bf = rendered_image.astype(jnp.bfloat16)
    gt_bf = gt_image.astype(jnp.bfloat16)
    total4, ld4 = total_loss(pred_coeffs, pred_verts, pred_landmarks_2d,
                             rend_bf, gt_bf, gt_landmarks_2d, loss_weights)
    total4 = jax.block_until_ready(total4)
    ref_total4, ref_parts4 = _reference(pred_coeffs, pred_landmarks_2d,
                                        rend_bf, gt_bf, gt_landmarks_2d,
                                        loss_weights)
    _check(total4, ld4, ref_total4, ref_parts4, 1e-4, 1e-6, "bf16/default")

    print("KERNEL_OK")
</pallas_src>

<mosaic_0001>
module attributes {stable_mosaic.version = 11 : i64} {
  func.func @kernel(%arg0: i32, %arg1: i32, %arg2: memref<192x128xf32, #tpu.memory_space<vmem>>, %arg3: memref<192x128xf32, #tpu.memory_space<vmem>>, %arg4: memref<8x128xf32, #tpu.memory_space<vmem>>, %arg5: memref<8x128xf32, #tpu.memory_space<vmem>>, %arg6: memref<8x128xf32, #tpu.memory_space<vmem>>, %arg7: memref<8x128xf32, #tpu.memory_space<vmem>>, %arg8: memref<1x8x128xf32, #tpu.memory_space<vmem>>, %arg9: memref<32x128xf32, #tpu.memory_space<vmem>>) attributes {dimension_semantics = [#tpu.dimension_semantics<parallel>, #tpu.dimension_semantics<arbitrary>], iteration_bounds = array<i64: 2, 1>, scalar_prefetch = 0 : i64, scratch_operands = 1 : i64, tpu.core_type = #tpu.core_type<tc>, window_params = [{transform_indices = @transform_0, window_bounds = array<i64: 192, 128>}, {transform_indices = @transform_1, window_bounds = array<i64: 192, 128>}, {pipeline_mode = #tpu.pipeline_mode<synchronous>, transform_indices = @transform_2, window_bounds = array<i64: 8, 128>}, {pipeline_mode = #tpu.pipeline_mode<synchronous>, transform_indices = @transform_3, window_bounds = array<i64: 8, 128>}, {pipeline_mode = #tpu.pipeline_mode<synchronous>, transform_indices = @transform_4, window_bounds = array<i64: 8, 128>}, {pipeline_mode = #tpu.pipeline_mode<synchronous>, transform_indices = @transform_5, window_bounds = array<i64: 8, 128>}, {transform_indices = @transform_6, window_bounds = array<i64: 1, 8, 128>}]} {
    %c0_i32 = arith.constant 0 : i32
    %0 = arith.cmpi eq, %arg1, %c0_i32 : i32
    %1 = arith.extui %0 : i1 to i32
    %c0_i32_0 = arith.constant 0 : i32
    %2 = arith.cmpi ne, %1, %c0_i32_0 : i32
    scf.if %2 {
      %cst = arith.constant 0.000000e+00 : f32
      %20 = vector.broadcast %cst : f32 to vector<32x128xf32>
      %c0_11 = arith.constant 0 : index
      %c0_12 = arith.constant 0 : index
      %21 = vector.load %arg9[%c0_11, %c0_12] : memref<32x128xf32, #tpu.memory_space<vmem>>, vector<32x128xf32>
      tpu.vector_store %arg9[%c0_11, %c0_12], %20 {strides = array<i32>} : memref<32x128xf32, #tpu.memory_space<vmem>>, vector<32x128xf32>,
    } else {
    }
    %c0 = arith.constant 0 : index
    %c0_1 = arith.constant 0 : index
    %3 = vector.load %arg2[%c0, %c0_1] : memref<192x128xf32, #tpu.memory_space<vmem>>, vector<192x128xf32>
    %c0_2 = arith.constant 0 : index
    %c0_3 = arith.constant 0 : index
    %4 = vector.load %arg3[%c0_2, %c0_3] : memref<192x128xf32, #tpu.memory_space<vmem>>, vector<192x128xf32>
    %5 = arith.subf %3, %4 : vector<192x128xf32>
    %6 = math.absf %5 : vector<192x128xf32>
    %c1_i32 = arith.constant 1 : i32
    %7 = arith.muli %arg0, %c1_i32 : i32
    %8 = arith.addi %7, %arg1 : i32
    %c192_i32 = arith.constant 192 : i32
    %9 = arith.muli %8, %c192_i32 : i32
    %c192_i32_4 = arith.constant 192 : i32
    %10 = arith.subi %c192_i32_4, %9 : i32
    %c192_i32_5 = arith.constant 192 : i32
    %11 = arith.cmpi sge, %10, %c192_i32_5 : i32
    %12 = arith.extui %11 : i1 to i32
    %c0_i32_6 = arith.constant 0 : i32
    %13 = arith.cmpi ne, %12, %c0_i32_6 : i32
    scf.if %13 {
      %c0_11 = arith.constant 0 : index
      %c0_12 = arith.constant 0 : index
      %20 = vector.load %arg9[%c0_11, %c0_12] : memref<32x128xf32, #tpu.memory_space<vmem>>, vector<32x128xf32>
      %21 = vector.shape_cast %6 : vector<192x128xf32> to vector<6x32x128xf32>
      %cst = arith.constant dense<0.000000e+00> : vector<32x128xf32>
      %22 = vector.multi_reduction <add>, %21, %cst [0] : vector<6x32x128xf32> to vector<32x128xf32>
      %23 = arith.addf %20, %22 : vector<32x128xf32>
      %c0_13 = arith.constant 0 : index
      %c0_14 = arith.constant 0 : index
      %24 = vector.load %arg9[%c0_13, %c0_14] : memref<32x128xf32, #tpu.memory_space<vmem>>, vector<32x128xf32>
      tpu.vector_store %arg9[%c0_13, %c0_14], %23 {strides = array<i32>} : memref<32x128xf32, #tpu.memory_space<vmem>>, vector<32x128xf32>,
    } else {
    }
    %c192_i32_7 = arith.constant 192 : i32
    %14 = arith.cmpi slt, %10, %c192_i32_7 : i32
    %15 = arith.extui %14 : i1 to i32
    %c0_i32_8 = arith.constant 0 : i32
    %16 = arith.cmpi ne, %15, %c0_i32_8 : i32
    scf.if %16 {
      %20 = tpu.iota {dimensions = array<i32: 0>} : vector<192x128xi32>
      %21 = vector.broadcast %10 : i32 to vector<192x128xi32>
      %22 = arith.cmpi slt, %20, %21 : vector<192x128xi32>
      %cst = arith.constant 0.000000e+00 : f32
      %23 = vector.broadcast %cst : f32 to vector<192x128xf32>
      %24 = arith.select %22, %6, %23 : vector<192x128xi1>, vector<192x128xf32>
      %c0_11 = arith.constant 0 : index
      %c0_12 = arith.constant 0 : index
      %25 = vector.load %arg9[%c0_11, %c0_12] : memref<32x128xf32, #tpu.memory_space<vmem>>, vector<32x128xf32>
      %26 = vector.shape_cast %24 : vector<192x128xf32> to vector<6x32x128xf32>
      %cst_13 = arith.constant dense<0.000000e+00> : vector<32x128xf32>
      %27 = vector.multi_reduction <add>, %26, %cst_13 [0] : vector<6x32x128xf32> to vector<32x128xf32>
      %28 = arith.addf %25, %27 : vector<32x128xf32>
      %c0_14 = arith.constant 0 : index
      %c0_15 = arith.constant 0 : index
      %29 = vector.load %arg9[%c0_14, %c0_15] : memref<32x128xf32, #tpu.memory_space<vmem>>, vector<32x128xf32>
      tpu.vector_store %arg9[%c0_14, %c0_15], %28 {strides = array<i32>} : memref<32x128xf32, #tpu.memory_space<vmem>>, vector<32x128xf32>,
    } else {
    }
    %c0_i32_9 = arith.constant 0 : i32
    %17 = arith.cmpi eq, %arg1, %c0_i32_9 : i32
    %18 = arith.extui %17 : i1 to i32
    %c0_i32_10 = arith.constant 0 : i32
    %19 = arith.cmpi ne, %18, %c0_i32_10 : i32
    scf.if %19 {
      %c0_11 = arith.constant 0 : index
      %c0_12 = arith.constant 0 : index
      %20 = vector.load %arg9[%c0_11, %c0_12] : memref<32x128xf32, #tpu.memory_space<vmem>>, vector<32x128xf32>
      %21 = vector.shape_cast %20 : vector<32x128xf32> to vector<1x32x128xf32>
      %cst = arith.constant dense<0.000000e+00> : vector<1xf32>
      %22 = vector.multi_reduction <add>, %21, %cst [1, 2] : vector<1x32x128xf32> to vector<1xf32>
      %23 = vector.shape_cast %22 : vector<1xf32> to vector<1x1x1xf32>
      %24 = vector.extract %23[0, 0, 0] : f32 from vector<1x1x1xf32>
      %c0_i32_13 = arith.constant 0 : i32
      %25 = arith.cmpi eq, %arg0, %c0_i32_13 : i32
      %cst_14 = arith.constant 1.000000e+00 : f32
      %cst_15 = arith.constant 0.000000e+00 : f32
      %26 = arith.select %25, %cst_14, %cst_15 : f32
      %c0_16 = arith.constant 0 : index
      %c0_17 = arith.constant 0 : index
      %27 = vector.load %arg4[%c0_16, %c0_17] : memref<8x128xf32, #tpu.memory_space<vmem>>, vector<8x128xf32>
      %c0_18 = arith.constant 0 : index
      %c0_19 = arith.constant 0 : index
      %28 = vector.load %arg5[%c0_18, %c0_19] : memref<8x128xf32, #tpu.memory_space<vmem>>, vector<8x128xf32>
      %29 = arith.subf %27, %28 : vector<8x128xf32>
      %30 = arith.mulf %29, %29 : vector<8x128xf32>
      %31 = vector.shape_cast %30 : vector<8x128xf32> to vector<1x8x128xf32>
      %cst_20 = arith.constant dense<0.000000e+00> : vector<1xf32>
      %32 = vector.multi_reduction <add>, %31, %cst_20 [1, 2] : vector<1x8x128xf32> to vector<1xf32>
      %33 = vector.shape_cast %32 : vector<1xf32> to vector<1x1x1xf32>
      %34 = vector.extract %33[0, 0, 0] : f32 from vector<1x1x1xf32>
      %35 = arith.mulf %34, %26 : f32
      %c0_21 = arith.constant 0 : index
      %c0_22 = arith.constant 0 : index
      %36 = vector.load %arg6[%c0_21, %c0_22] : memref<8x128xf32, #tpu.memory_space<vmem>>, vector<8x128xf32>
      %37 = arith.mulf %36, %36 : vector<8x128xf32>
      %38 = vector.shape_cast %37 : vector<8x128xf32> to vector<1x8x128xf32>
      %cst_23 = arith.constant dense<0.000000e+00> : vector<1xf32>
      %39 = vector.multi_reduction <add>, %38, %cst_23 [1, 2] : vector<1x8x128xf32> to vector<1xf32>
      %40 = vector.shape_cast %39 : vector<1xf32> to vector<1x1x1xf32>
      %41 = vector.extract %40[0, 0, 0] : f32 from vector<1x1x1xf32>
      %42 = arith.mulf %41, %26 : f32
      %c0_24 = arith.constant 0 : index
      %c0_25 = arith.constant 0 : index
      %43 = vector.load %arg7[%c0_24, %c0_25] : memref<8x128xf32, #tpu.memory_space<vmem>>, vector<8x128xf32>
      %44 = arith.mulf %43, %43 : vector<8x128xf32>
      %45 = vector.shape_cast %44 : vector<8x128xf32> to vector<1x8x128xf32>
      %cst_26 = arith.constant dense<0.000000e+00> : vector<1xf32>
      %46 = vector.multi_reduction <add>, %45, %cst_26 [1, 2] : vector<1x8x128xf32> to vector<1xf32>
      %47 = vector.shape_cast %46 : vector<1xf32> to vector<1x1x1xf32>
      %48 = vector.extract %47[0, 0, 0] : f32 from vector<1x1x1xf32>
      %49 = arith.mulf %48, %26 : f32
      %50 = tpu.iota {dimensions = array<i32: 0>} : vector<8x128xi32>
      %c0_i32_27 = arith.constant 0 : i32
      %51 = vector.broadcast %c0_i32_27 : i32 to vector<8x128xi32>
      %52 = arith.cmpi eq, %50, %51 : vector<8x128xi32>
      %cst_28 = arith.constant 0.000000e+00 : f32
      %53 = vector.broadcast %24 : f32 to vector<8x128xf32>
      %54 = vector.broadcast %cst_28 : f32 to vector<8x128xf32>
      %55 = arith.select %52, %53, %54 : vector<8x128xi1>, vector<8x128xf32>
      %c1_i32_29 = arith.constant 1 : i32
      %56 = vector.broadcast %c1_i32_29 : i32 to vector<8x128xi32>
      %57 = arith.cmpi eq, %50, %56 : vector<8x128xi32>
      %cst_30 = arith.constant 0.000000e+00 : f32
      %58 = vector.broadcast %35 : f32 to vector<8x128xf32>
      %59 = vector.broadcast %cst_30 : f32 to vector<8x128xf32>
      %60 = arith.select %57, %58, %59 : vector<8x128xi1>, vector<8x128xf32>
      %61 = arith.addf %55, %60 : vector<8x128xf32>
      %c2_i32 = arith.constant 2 : i32
      %62 = vector.broadcast %c2_i32 : i32 to vector<8x128xi32>
      %63 = arith.cmpi eq, %50, %62 : vector<8x128xi32>
      %cst_31 = arith.constant 0.000000e+00 : f32
      %64 = vector.broadcast %42 : f32 to vector<8x128xf32>
      %65 = vector.broadcast %cst_31 : f32 to vector<8x128xf32>
      %66 = arith.select %63, %64, %65 : vector<8x128xi1>, vector<8x128xf32>
      %67 = arith.addf %61, %66 : vector<8x128xf32>
      %c3_i32 = arith.constant 3 : i32
      %68 = vector.broadcast %c3_i32 : i32 to vector<8x128xi32>
      %69 = arith.cmpi eq, %50, %68 : vector<8x128xi32>
      %cst_32 = arith.constant 0.000000e+00 : f32
      %70 = vector.broadcast %49 : f32 to vector<8x128xf32>
      %71 = vector.broadcast %cst_32 : f32 to vector<8x128xf32>
      %72 = arith.select %69, %70, %71 : vector<8x128xi1>, vector<8x128xf32>
      %73 = arith.addf %67, %72 : vector<8x128xf32>
      %c0_33 = arith.constant 0 : index
      %c0_34 = arith.constant 0 : index
      %c0_35 = arith.constant 0 : index
      %74 = vector.load %arg8[%c0_33, %c0_34, %c0_35] : memref<1x8x128xf32, #tpu.memory_space<vmem>>, vector<1x8x128xf32>
      %75 = vector.shape_cast %74 : vector<1x8x128xf32> to vector<8x128xf32>
      %76 = vector.shape_cast %73 : vector<8x128xf32> to vector<1x8x128xf32>
      tpu.vector_store %arg8[%c0_33, %c0_34, %c0_35], %76 {strides = array<i32>} : memref<1x8x128xf32, #tpu.memory_space<vmem>>, vector<1x8x128xf32>,
    } else {
    }
    return
  }
  func.func @transform_0(%arg0: i32, %arg1: i32) -> (i32, i32) {
    %c1_i32 = arith.constant 1 : i32
    %0 = arith.muli %arg0, %c1_i32 : i32
    %1 = arith.addi %0, %arg1 : i32
    %c0_i32 = arith.constant 0 : i32
    %2 = arith.minsi %1, %c0_i32 : i32
    %c0_i32_0 = arith.constant 0 : i32
    %c0_i32_1 = arith.constant 0 : i32
    return %2, %c0_i32_0 : i32, i32
  }
  func.func @transform_1(%arg0: i32, %arg1: i32) -> (i32, i32) {
    %c1_i32 = arith.constant 1 : i32
    %0 = arith.muli %arg0, %c1_i32 : i32
    %1 = arith.addi %0, %arg1 : i32
    %c0_i32 = arith.constant 0 : i32
    %2 = arith.minsi %1, %c0_i32 : i32
    %c0_i32_0 = arith.constant 0 : i32
    %c0_i32_1 = arith.constant 0 : i32
    return %2, %c0_i32_0 : i32, i32
  }
  func.func @transform_2(%arg0: i32, %arg1: i32) -> (i32, i32) {
    %c0_i32 = arith.constant 0 : i32
    %c0_i32_0 = arith.constant 0 : i32
    %c0_i32_1 = arith.constant 0 : i32
    return %c0_i32, %c0_i32_0 : i32, i32
  }
  func.func @transform_3(%arg0: i32, %arg1: i32) -> (i32, i32) {
    %c0_i32 = arith.constant 0 : i32
    %c0_i32_0 = arith.constant 0 : i32
    %c0_i32_1 = arith.constant 0 : i32
    return %c0_i32, %c0_i32_0 : i32, i32
  }
  func.func @transform_4(%arg0: i32, %arg1: i32) -> (i32, i32) {
    %c0_i32 = arith.constant 0 : i32
    %c0_i32_0 = arith.constant 0 : i32
    %c0_i32_1 = arith.constant 0 : i32
    return %c0_i32, %c0_i32_0 : i32, i32
  }
  func.func @transform_5(%arg0: i32, %arg1: i32) -> (i32, i32) {
    %c0_i32 = arith.constant 0 : i32
    %c0_i32_0 = arith.constant 0 : i32
    %c0_i32_1 = arith.constant 0 : i32
    return %c0_i32, %c0_i32_0 : i32, i32
  }
  func.func @transform_6(%arg0: i32, %arg1: i32) -> (i32, i32, i32) {
    %c0_i32 = arith.constant 0 : i32
    %c0_i32_0 = arith.constant 0 : i32
    %c0_i32_1 = arith.constant 0 : i32
    return %arg0, %c0_i32, %c0_i32_0 : i32, i32, i32
  }
}

</mosaic_0001>

<bundles_post_ra>
// kernel: tpu_custom_call.1
= control target key start
LH: loop header
LB: loop body
LE: loop exit
PB: predicated region body
PF: predicated region fallthrough
CT: control target
= control target key end

     0   :  { %s1803_s0 = inlined_call_operand.hbm [shape: f32[192,128], index: 0, kind: input, shape index: {}]   ;;  %s1804_s1 = inlined_call_operand.hbm [shape: f32[192,128], index: 1, kind: input, shape index: {}]   ;;  %s1805_s2 = inlined_call_operand.hbm [shape: f32[8,128], index: 2, kind: input, shape index: {}]   ;;  %s1806_s3 = inlined_call_operand.vmem [shape: f32[8,128], index: 3, kind: input, shape index: {}]   ;;  %s1807_s4 = inlined_call_operand.hbm [shape: f32[8,128], index: 4, kind: input, shape index: {}]   ;;  %s1808_s5 = inlined_call_operand.vmem [shape: f32[8,128], index: 5, kind: input, shape index: {}]   ;;  %s1809_s6 = inlined_call_operand.hbm [shape: f32[2,8,128], index: 6, kind: output, shape index: {}]  }
   0x1   :  { %1819 = sst [smem:[#allocation21_spill]] %s1805_s2 }
   0x2   :  { %1820 = sst [smem:[#allocation22_spill]] %s1807_s4 }
   0x3   :  { %11 = vsyncpa [#allocation4], 0 }
   0x4   :  { %13 = vsyncpa [#allocation4 + $0x1], 0 }
   0x5   :  { %14 = vsyncpa [#allocation7], 0 }
   0x6   :  { %16 = vsyncpa [#allocation7 + $0x1], 0 }
   0x7   :  { %17 = vsyncpa [#allocation10], 0 }
   0x8   :  { %18 = vsyncpa [#allocation5], 0 }
   0x9   :  { %20 = vsyncpa [#allocation5 + $0x1], 0  ;;  %s1259_s21 = smov 0   ;;  %s1261_s22 = smov 0  }
   0xa   :  { %s1263_s23 = smov 0   ;;  %s1265_s24 = smov 0  }
   0xb   :  { %s1267_s25 = smov 0   ;;  %s1269_s26 = smov 0  }
   0xc   :  { %s1271_s27 = smov 0   ;;  %s1273_s28 = smov 0  }
   0xd LB: > { %1821 = sst [smem:[#allocation17_spill]] %s1186_s21  ;;  %s1298_s29 = sadd.s32 4294967295, %s1214_s28   ;;  %s1214_s28 = sphi %s1273_s28, %s26_s28   ;;  %s1210_s27 = sphi %s1271_s27, %s1848_s27   ;;  %s1206_s26 = sphi %s1269_s26, %s1847_s26   ;;  %s1202_s25 = sphi %s1267_s25, %s1793_s25   ;;  %s1198_s24 = sphi %s1265_s24, %s1852_s24   ;;  %s1194_s23 = sphi %s1263_s23, %s1851_s23   ;;  %s1190_s22 = sphi %s1261_s22, %s1850_s22   ;;  %s1186_s21 = sphi %s1259_s21, %s1849_s21  }
   0xe   : > { %1822 = sst [smem:[#allocation18_spill]] %s1210_s27  ;;  %s838_s30 = sadd.s32 4294967294, %s1214_s28  }
   0xf   : > { %p1183_p0 = scmp.ne.s32.totalorder %s1202_s25, 0  ;;  %p59_p1 = scmp.eq.s32.totalorder %s1214_s28, 0 }
  0x10   : > { %p64_p2 = scmp.ne.s32.totalorder %s1202_s25, %s1198_s24  ;;  %p1810_p3 = scmp.eq.s32.totalorder %s1298_s29, 0 }
  0x11   : > { %p1306_p4 = por %p1183_p0, %p59_p1  ;;  %p203_p5 = scmp.ne.s32.totalorder %s1194_s23, %s1190_s22 }
  0x12   : > { %p1314_p6 = por %p1810_p3, %p64_p2  ;;  %p204_p7 = scmp.eq.s32.totalorder %s1298_s29, 1 }
  0x13   : > { %p209_p8 = scmp.ne.s32.totalorder %s1190_s22, %s1186_s21  ;;  %p210_p9 = scmp.eq.s32.totalorder %s838_s30, 1 }
  0x14   : > { %s1824_s9 = scalar_select %p1314_p6, 1, 0 }
  0x15   : > { %p1321_p10 = por %p204_p7, %p203_p5  ;;  %p839_p11 = scmp.ge.s32.totalorder %s1214_s28, 1 }
  0x16   : > { %p1326_p12 = por %p210_p9, %p209_p8  ;;  %p217_p13 = scmp.lt.s32.totalorder %s1214_s28, 3 }
  0x17   : > { %s1825_s10 = scalar_select %p1321_p10, 1, 0 }
  0x18   : > { %s1826_s11 = scalar_select %p1326_p12, 1, 0 }
  0x19   : > { %p1331_p0 = pnand %p839_p11, %p217_p13  ;;  %s1216_s13 = smov [#allocation8]  }
  0x1a   : > { %1827 = sst [smem:[#allocation19_spill]] %s1826_s11  ;;  %s230_s14 = sshll.u32 %s1216_s13, 4  ;;  %s231_s14 = int_to_ptr.vmem [resolvable:$true] %s230_s14 }
  0x1b   : > { %s1828_s12 = scalar_select %p1331_p0, 1, 0 }
  0x1c   : > { %p882_p2 = pneg %p1331_p0  ;;  %p902_p5 = scmp.lt.s32.totalorder %s1214_s28, 2 }
  0x1d   : > { %s1217_s17 = smov [#allocation9]   ;;  %s1831_s2 = sld [smem:[#allocation21_spill]] }
  0x1e   : > { %p1341_p7 = pnand %p882_p2, %p1810_p3  ;;  %p1347_p8 = pnand %p902_p5, %p1306_p4 }
  0x1f   : > { %s244_s18 = sshll.u32 %s1217_s17, 4  ;;  %s245_s18 = int_to_ptr.vmem [resolvable:$true] %s244_s18 }
  0x20   : > { %s1830_s16 = scalar_select %p1347_p8, 1, 0 }
  0x21   : > { %p985_p11 = pneg %p1341_p7 }
  0x23   : > { %s983_s24 = scalar_lea.hbm %s1831_s2, 128 }
  0x24   : > { %p984_p9 = scmp.ne.s32.totalorder %s1831_s2, %s983_s24  ;;  %p990_p4 = scmp.lt.u32.totalorder %s983_s24, %s1831_s2 }
  0x26   : > { %p986_p13 = pnand %p985_p11, %p984_p9 }
  0x28   : > { %p987_p2 = pneg %p986_p13 }
  0x2a   : > { %p992_p5 = pnand %p990_p4, %p987_p2 }
  0x2c   : > { %995 = shalt.err (!%p992_p5)
}
  0x2d   : > { %s996_s17 = scalar_lea.vmem %s231_s14, 128  ;;  %p1004_p10 = scmp.lt.s32.totalorder %s231_s14, %s231_s14 }
  0x2e   : > { %p997_p1 = scmp.ne.s32.totalorder %s231_s14, %s996_s17  ;;  %p1005_p6 = scmp.lt.s32.totalorder %s996_s17, %s996_s17 }
  0x30   : > { %p999_p3 = pnand %p997_p1, %p985_p11  ;;  %p1006_p0 = por %p1005_p6, %p1004_p10 }
  0x32   : > { %p1000_p12 = pneg %p999_p3 }
  0x34   : > { %p1007_p8 = pnand %p1006_p0, %p1000_p12 }
  0x36   : > { %1010 = shalt.err (!%p1007_p8)
}
  0x37   : > { %885 = dma.hbm_to_vmem [thread:$0]  (!%p1341_p7), %s1831_s2, 128, %s231_s14, [#allocation7]  }
  0x38   : > { %s38_s7 = sadd.s32 1, %s1210_s27  ;;  %s1832_s4 = sld [smem:[#allocation22_spill]] }
  0x3e   : > { %s1011_s13 = scalar_lea.hbm %s1832_s4, 128 }
  0x3f   : > { %p1012_p3 = scmp.ne.s32.totalorder %s1832_s4, %s1011_s13  ;;  %p1018_p12 = scmp.lt.u32.totalorder %s1011_s13, %s1832_s4 }
  0x41   : > { %p1014_p6 = pnand %p1012_p3, %p985_p11 }
  0x43   : > { %p1015_p10 = pneg %p1014_p6 }
  0x45   : > { %p1020_p0 = pnand %p1018_p12, %p1015_p10 }
  0x47   : > { %1023 = shalt.err (!%p1020_p0)
}
  0x48   : > { %s1024_s14 = scalar_lea.vmem %s245_s18, 128  ;;  %p1032_p13 = scmp.lt.s32.totalorder %s245_s18, %s245_s18 }
  0x49   : > { %p1025_p1 = scmp.ne.s32.totalorder %s245_s18, %s1024_s14  ;;  %p1033_p2 = scmp.lt.s32.totalorder %s1024_s14, %s1024_s14 }
  0x4b   : > { %p1027_p8 = pnand %p1025_p1, %p985_p11  ;;  %p1034_p4 = por %p1033_p2, %p1032_p13 }
  0x4d   : > { %p1028_p9 = pneg %p1027_p8 }
  0x4f   : > { %p1035_p5 = pnand %p1034_p4, %p1028_p9 }
  0x51   : > { %1038 = shalt.err (!%p1035_p5)
}
  0x52   : > { %888 = dma.hbm_to_vmem [thread:$0]  (!%p1341_p7), %s1832_s4, 128, %s245_s18, [#allocation10]  }
  0x53   : > { %p40_p3 = scmp.ge.s32.totalorder %s38_s7, 2  ;;  %s1834_s20 = sadd.s32 1, %s1194_s23 }
  0x54   : > { %s1218_s15 = smov [#allocation3]   ;;  %s282_s13 = sand.u32 1, %s1214_s28  }
  0x55   : > { %s1854_s7 = smov (%p40_p3, %s38_s7), 0  ;;  %s272_s30 = sshll.u32 %s1218_s15, 4  ;;  %s273_s30 = int_to_ptr.vmem [resolvable:$true] %s272_s30 }
  0x56   : > { %1833 = sst [smem:[#allocation20_spill]] %s1854_s7  ;;  %s190_s21 = ssub.s32 %s1210_s27, %s1854_s7 }
  0x57   : > { %p191_p11 = scmp.eq.s32.totalorder %s190_s21, 0  ;;  %s1039_s14 = scalar_lea.hbm %s1803_s0, 3072 }
  0x58   : > { %p1040_p7 = scmp.ne.s32.totalorder %s1803_s0, %s1039_s14  ;;  %p1835_p6 = scmp.ne.s32.totalorder %s1830_s16, 0 }
  0x59   : > { %s1401_s24 = scalar_select %p191_p11, %s1194_s23, %s1834_s20  }
  0x5a   : > { %p1041_p10 = pneg %p1835_p6  ;;  %p1046_p1 = scmp.lt.u32.totalorder %s1039_s14, %s1039_s14 }
  0x5b   : > { %p1048_p8 = scmp.lt.u32.totalorder %s1039_s14, %s1803_s0 }
  0x5c   : > { %p1042_p12 = pnand %p1041_p10, %p1040_p7 }
  0x5d   : > { %p1049_p9 = por %p1048_p8, %p1046_p1 }
  0x5e   : > { %p1043_p0 = pneg %p1042_p12 }
  0x60   : > { %p1050_p13 = pnand %p1049_p9, %p1043_p0 }
  0x62   : > { %1053 = shalt.err (!%p1050_p13)
}
  0x63   : > { %s1054_s20 = scalar_lea.vmem %s273_s30, 3072  ;;  %s1061_s15 = scalar_lea.vmem %s273_s30, 6144 }
  0x64   : > { %p1055_p2 = scmp.ne.s32.totalorder %s273_s30, %s1054_s20  ;;  %p1062_p3 = scmp.lt.s32.totalorder %s273_s30, %s273_s30 }
  0x65   : > { %p1063_p11 = scmp.lt.s32.totalorder %s1061_s15, %s1054_s20 }
  0x66   : > { %p1057_p4 = pnand %p1055_p2, %p1041_p10 }
  0x67   : > { %p1064_p7 = por %p1063_p11, %p1062_p3 }
  0x68   : > { %p1058_p5 = pneg %p1057_p4 }
  0x6a   : > { %p1065_p12 = pnand %p1064_p7, %p1058_p5 }
  0x6c   : > { %1068 = shalt.err (!%p1065_p12)
}
  0x6d   : > { %s1219_s8 = smov 128   ;;  %s1220_s17 = smov 8  }
  0x6e   : > { %892 = dma.hbm_to_vmem [thread:$0]  (!%p1835_p6), %s1803_s0, 3072, %s273_s30, [#allocation4], %s1219_s8, %s1219_s8, %s1220_s17  }
  0x6f   : > { %s1221_s19 = smov [#allocation6]   ;;  %s283_s21 = scalar_lea.sflag [#allocation7], %s282_s13 }
  0x70   : > { %s296_s18 = sshll.u32 %s1221_s19, 4  ;;  %s1069_s2 = scalar_lea.hbm %s1804_s1, 3072  ;;  %s297_s18 = int_to_ptr.vmem [resolvable:$true] %s296_s18 }
  0x71   : > { %p1070_p0 = scmp.ne.s32.totalorder %s1804_s1, %s1069_s2  ;;  %p1076_p9 = scmp.lt.u32.totalorder %s1069_s2, %s1069_s2 }
  0x72   : > { %p1078_p13 = scmp.lt.u32.totalorder %s1069_s2, %s1804_s1 }
  0x73   : > { %p1072_p1 = pnand %p1070_p0, %p1041_p10 }
  0x74   : > { %p1079_p2 = por %p1078_p13, %p1076_p9 }
  0x75   : > { %p1073_p8 = pneg %p1072_p1 }
  0x77   : > { %p1080_p4 = pnand %p1079_p2, %p1073_p8 }
  0x79   : > { %1083 = shalt.err (!%p1080_p4)
}
  0x7a   : > { %s1084_s30 = scalar_lea.vmem %s297_s18, 3072  ;;  %s1091_s4 = scalar_lea.vmem %s297_s18, 6144 }
  0x7b   : > { %p1085_p5 = scmp.ne.s32.totalorder %s297_s18, %s1084_s30  ;;  %p1092_p7 = scmp.lt.s32.totalorder %s297_s18, %s297_s18 }
  0x7c   : > { %p1093_p12 = scmp.lt.s32.totalorder %s1091_s4, %s1084_s30 }
  0x7d   : > { %p1087_p3 = pnand %p1085_p5, %p1041_p10 }
  0x7e   : > { %p1094_p0 = por %p1093_p12, %p1092_p7 }
  0x7f   : > { %p1088_p11 = pneg %p1087_p3 }
  0x81   : > { %p1095_p1 = pnand %p1094_p0, %p1088_p11 }
  0x83   : > { %1098 = shalt.err (!%p1095_p1)
}
  0x84   : > { %895 = dma.hbm_to_vmem [thread:$0]  (!%p1835_p6), %s1804_s1, 3072, %s297_s18, %s283_s21, %s1219_s8, %s1219_s8, %s1220_s17  }
  0x85   : > { %p1836_p8 = scmp.ne.s32.totalorder %s1828_s12, 0 }
  0x86   : > { %s310_s7 = sand.u32 (!%p1836_p8), 1, %s1202_s25   ;;  %p1837_p10 = scmp.ne.s32.totalorder (!%p1836_p8), %s1824_s9, 0 }
  0x87   : > { %308 = sbr.rel (%p1836_p8) target bundleno = 465 (0x1d1), region = 44  ;;  %s311_s11 = scalar_lea.sflag (!%p1836_p8), [#allocation4], %s310_s7 }
  0x88   : > { %s859_s13 = smul.u32 (!%p1836_p8), 192, %s310_s7 }
  0x8a   : > { %s1455_s19 = scalar_lea.vmem (!%p1836_p8), [#allocation3], %s859_s13 }
  0x8e   : > { %1164 = dma.done.wait (%p1837_p10), %s311_s11, 3072  }
  0x8f   : > { %1166 = vsyncadd (%p1837_p10), %s311_s11, 4294964224  ;;  %s319_s16 = sand.u32 1, %s1298_s29   ;;  %s1462_s8 = scalar_lea.vmem [#allocation6], %s859_s13 }
  0x90   : > { %s320_s20 = scalar_lea.sflag [#allocation7], %s319_s16 }
  0x91   : > { %1168 = dma.done.wait (%p1837_p10), %s320_s20, 3072  }
  0x92   : > { %1170 = vsyncadd (%p1837_p10), %s320_s20, 4294964224  ;;  %p1838_p6 = scmp.eq.s32.totalorder %s1298_s29, 0 }
  0x94   : > { %1172 = dma.done.wait (%p1838_p6), [#allocation7], 128   ;;  %p1839_p9 = pmov %p1838_p6 }
  0x95   : > { %p1840_p13 = pmov %p1838_p6 }
  0x96   : > { %1174 = vsyncadd (%p1839_p9), [#allocation7], 4294967168 }
  0x97   : > { %1176 = dma.done.wait (%p1840_p13), [#allocation10], 128   ;;  %p1841_p2 = pmov %p1838_p6 }
  0x98   : > { %s362_s9 = sand.u32 1, %s1190_s22   ;;  %s478_s12 = smul.u32 192, %s1206_s26  ;;  %v1222_v0 = vmov 0.0   ;;  %v381_v1 = vld [vmem:[%s1455_s19] sm:$0xff]  ;;  %v382_v2 = vld [vmem:[%s1455_s19 + $0x8] sm:$0xff]  ;;  %v383_v3 = vld [vmem:[%s1455_s19 + $0x10] sm:$0xff] }
  0x99   : > { %1178 = vsyncadd (%p1841_p2), [#allocation10], 4294967168  ;;  %s1480_s17 = sshll.u32 %s362_s9, 3  ;;  %377 = vst [vmem:[#allocation2] sm:$0xff] %v1222_v0  ;;  %v384_v4 = vld [vmem:[%s1455_s19 + $0x18] sm:$0xff]  ;;  %v1489_v5 = vld [vmem:[%s1455_s19 + $0x20] sm:$0xff] }
  0x9a   : > { %378 = vst [vmem:[#allocation2 + $0x8] sm:$0xff] %v1222_v0  ;;  %379 = vst [vmem:[#allocation2 + $0x10] sm:$0xff] %v1222_v0  ;;  %s1482_s29 = ssub.s32 192, %s478_s12  ;;  %v1492_v6 = vld [vmem:[%s1455_s19 + $0x28] sm:$0xff]  ;;  %v1495_v7 = vld [vmem:[%s1455_s19 + $0x30] sm:$0xff]  ;;  %s364_s18 = scalar_lea.vmem [#allocation11], %s1480_s17 }
  0x9b   : > { %380 = vst [vmem:[#allocation2 + $0x18] sm:$0xff] %v1222_v0  ;;  %v1498_v8 = vld [vmem:[%s1455_s19 + $0x38] sm:$0xff]  ;;  %v1501_v9 = vld [vmem:[%s1455_s19 + $0x40] sm:$0xff]  ;;  %v1504_v10 = vld [vmem:[%s1455_s19 + $0x48] sm:$0xff]  ;;  %p849_p4 = scmp.lt.s32.totalorder %s1482_s29, 192 }
  0x9c   : > { %v1507_v11 = vld [vmem:[%s1455_s19 + $0x50] sm:$0xff]  ;;  %v1510_v12 = vld [vmem:[%s1455_s19 + $0x58] sm:$0xff]  ;;  %v1513_v13 = vld [vmem:[%s1455_s19 + $0x60] sm:$0xff] }
  0x9d   : > { %v405_v14 = vld [vmem:[%s1462_s8] sm:$0xff]  ;;  %v406_v15 = vld [vmem:[%s1462_s8 + $0x8] sm:$0xff]  ;;  %v407_v16 = vld [vmem:[%s1462_s8 + $0x10] sm:$0xff] }
  0x9e   : > { %v1519_v17 = vld [vmem:[%s1455_s19 + $0x68] sm:$0xff]  ;;  %v1522_v18 = vld [vmem:[%s1455_s19 + $0x70] sm:$0xff]  ;;  %v1525_v19 = vld [vmem:[%s1455_s19 + $0x78] sm:$0xff]  ;;  %v429_v23 = vsub.f32 %v381_v1, %v405_v14  ;;  %v430_v24 = vsub.f32 %v382_v2, %v406_v15  ;;  %v431_v25 = vsub.f32 %v383_v3, %v407_v16 }
  0x9f   : > { %v408_v20 = vld [vmem:[%s1462_s8 + $0x18] sm:$0xff]  ;;  %v409_v21 = vld [vmem:[%s1462_s8 + $0x20] sm:$0xff]  ;;  %v410_v22 = vld [vmem:[%s1462_s8 + $0x28] sm:$0xff] }
  0xa0   : > { %v1531_v26 = vld [vmem:[%s1455_s19 + $0x80] sm:$0xff]  ;;  %v1534_v27 = vld [vmem:[%s1455_s19 + $0x88] sm:$0xff]  ;;  %v1537_v28 = vld [vmem:[%s1455_s19 + $0x90] sm:$0xff]  ;;  %v432_v32 = vsub.f32 %v384_v4, %v408_v20  ;;  %v433_v39 = vsub.f32 %v1489_v5, %v409_v21  ;;  %v434_v40 = vsub.f32 %v1492_v6, %v410_v22  ;;  %v1551_v42 = vand.u32 2147483647, %v429_v23 }
  0xa1   : > { %v411_v29 = vld [vmem:[%s1462_s8 + $0x30] sm:$0xff]  ;;  %v412_v30 = vld [vmem:[%s1462_s8 + $0x38] sm:$0xff]  ;;  %v413_v31 = vld [vmem:[%s1462_s8 + $0x40] sm:$0xff]  ;;  %v1560_v50 = vand.u32 2147483647, %v430_v24 }
  0xa2   : > { %v400_v33 = vld [vmem:[%s1455_s19 + $0x98] sm:$0xff]  ;;  %v401_v34 = vld [vmem:[%s1455_s19 + $0xa0] sm:$0xff]  ;;  %v402_v35 = vld [vmem:[%s1455_s19 + $0xa8] sm:$0xff]  ;;  %v435_v41 = vsub.f32 %v1495_v7, %v411_v29  ;;  %v436_v47 = vsub.f32 %v1498_v8, %v412_v30  ;;  %v437_v48 = vsub.f32 %v1501_v9, %v413_v31  ;;  %v1569_v58 = vand.u32 2147483647, %v431_v25 }
  0xa3   : > { %v414_v36 = vld [vmem:[%s1462_s8 + $0x48] sm:$0xff]  ;;  %v415_v37 = vld [vmem:[%s1462_s8 + $0x50] sm:$0xff]  ;;  %v416_v38 = vld [vmem:[%s1462_s8 + $0x58] sm:$0xff]  ;;  %v1577_v1 = vand.u32 2147483647, %v432_v32 }
  0xa4   : > { %v403_v43 = vld [vmem:[%s1455_s19 + $0xb0] sm:$0xff]  ;;  %v417_v44 = vld [vmem:[%s1462_s8 + $0x60] sm:$0xff]  ;;  %v418_v45 = vld [vmem:[%s1462_s8 + $0x68] sm:$0xff]  ;;  %v438_v49 = vsub.f32 %v1504_v10, %v414_v36  ;;  %v439_v55 = vsub.f32 %v1507_v11, %v415_v37  ;;  %v440_v56 = vsub.f32 %v1510_v12, %v416_v38  ;;  %v1585_v8 = vand.u32 2147483647, %v433_v39 }
  0xa5   : > { %v419_v46 = vld [vmem:[%s1462_s8 + $0x70] sm:$0xff]  ;;  %v404_v51 = vld [vmem:[%s1455_s19 + $0xb8] sm:$0xff]  ;;  %v421_v53 = vld [vmem:[%s1462_s8 + $0x80] sm:$0xff]  ;;  %v441_v57 = vsub.f32 %v1513_v13, %v417_v44  ;;  %v442_v62 = vsub.f32 %v1519_v17, %v418_v45  ;;  %v1587_v12 = vand.u32 2147483647, %v434_v40 }
  0xa6   : > { %v420_v52 = vld [vmem:[%s1462_s8 + $0x78] sm:$0xff]  ;;  %v422_v54 = vld [vmem:[%s1462_s8 + $0x88] sm:$0xff]  ;;  %v423_v59 = vld [vmem:[%s1462_s8 + $0x90] sm:$0xff]  ;;  %v443_v63 = vsub.f32 %v1522_v18, %v419_v46  ;;  %v445_v5 = vsub.f32 %v1531_v26, %v421_v53  ;;  %v1589_v14 = vand.u32 2147483647, %v435_v41 }
  0xa7   : > { %v424_v60 = vld [vmem:[%s1462_s8 + $0x98] sm:$0xff]  ;;  %v425_v61 = vld [vmem:[%s1462_s8 + $0xa0] sm:$0xff]  ;;  %v444_v0 = vsub.f32 %v1525_v19, %v420_v52  ;;  %v426_v2 = vld [vmem:[%s1462_s8 + $0xa8] sm:$0xff]  ;;  %v446_v6 = vsub.f32 %v1534_v27, %v422_v54  ;;  %v447_v7 = vsub.f32 %v1537_v28, %v423_v59  ;;  %v1591_v15 = vand.u32 2147483647, %v436_v47 }
  0xa8   : > { %v427_v3 = vld [vmem:[%s1462_s8 + $0xb0] sm:$0xff]  ;;  %v428_v4 = vld [vmem:[%s1462_s8 + $0xb8] sm:$0xff]  ;;  %v448_v9 = vsub.f32 %v400_v33, %v424_v60  ;;  %v449_v10 = vsub.f32 %v401_v34, %v425_v61  ;;  %v450_v11 = vsub.f32 %v402_v35, %v426_v2  ;;  %v1593_v16 = vand.u32 2147483647, %v437_v48  ;;  %483 = sbr.rel (%p849_p4) target bundleno = 186 (0xba), region = 68  ;;  %v484_v46 = vld [vmem:[#allocation2] sm:$0xff] (!%p849_p4) }
  0xa9   : > { %v451_v13 = vsub.f32 %v403_v43, %v427_v3  ;;  %v452_v17 = vsub.f32 %v404_v51, %v428_v4  ;;  %v1595_v18 = vand.u32 2147483647, %v438_v49  ;;  %v1597_v19 = vand.u32 2147483647, %v439_v55  ;;  %v485_v52 = vld [vmem:[#allocation2 + $0x8] sm:$0xff] (!%p849_p4)  ;;  %v486_v53 = vld [vmem:[#allocation2 + $0x10] sm:$0xff] (!%p849_p4) }
  0xaa   : > { %v1599_v20 = vand.u32 2147483647, %v440_v56  ;;  %v1601_v21 = vand.u32 2147483647, %v441_v57  ;;  %v1603_v22 = vand.u32 2147483647, %v442_v62  ;;  %v488_v33 = vadd.f32 (!%p849_p4), %v1585_v8, %v1551_v42 }
  0xab   : > { %v1605_v23 = vand.u32 2147483647, %v443_v63  ;;  %v1607_v24 = vand.u32 2147483647, %v444_v0  ;;  %v1609_v25 = vand.u32 2147483647, %v445_v5  ;;  %v493_v34 = vadd.f32 (!%p849_p4), %v1587_v12, %v1560_v50 }
  0xac   : > { %v1611_v26 = vand.u32 2147483647, %v446_v6  ;;  %v1613_v27 = vand.u32 2147483647, %v447_v7  ;;  %v1615_v28 = vand.u32 2147483647, %v448_v9  ;;  %v498_v35 = vadd.f32 (!%p849_p4), %v1589_v14, %v1569_v58 }
  0xad   : > { %v1617_v29 = vand.u32 2147483647, %v449_v10  ;;  %v1619_v30 = vand.u32 2147483647, %v450_v11  ;;  %v1621_v31 = vand.u32 2147483647, %v451_v13  ;;  %v503_v36 = vadd.f32 (!%p849_p4), %v1591_v15, %v1577_v1 }
  0xae   : > { %v1623_v32 = vand.u32 2147483647, %v452_v17  ;;  %v489_v37 = vadd.f32 (!%p849_p4), %v488_v33, %v1593_v16  ;;  %v494_v38 = vadd.f32 (!%p849_p4), %v493_v34, %v1595_v18  ;;  %v499_v39 = vadd.f32 (!%p849_p4), %v498_v35, %v1597_v19  ;;  %v487_v54 = vld [vmem:[#allocation2 + $0x18] sm:$0xff] (!%p849_p4) }
  0xaf   : > { %v504_v40 = vadd.f32 %v503_v36, %v1599_v20 }
  0xb0   : > { %v490_v41 = vadd.f32 %v489_v37, %v1601_v21  ;;  %v495_v43 = vadd.f32 %v494_v38, %v1603_v22  ;;  %v500_v44 = vadd.f32 %v499_v39, %v1605_v23 }
  0xb1   : > { %v505_v45 = vadd.f32 %v504_v40, %v1607_v24 }
  0xb2   : > { %v491_v47 = vadd.f32 %v490_v41, %v1609_v25  ;;  %v496_v48 = vadd.f32 %v495_v43, %v1611_v26  ;;  %v501_v49 = vadd.f32 %v500_v44, %v1613_v27 }
  0xb3   : > { %v506_v51 = vadd.f32 %v505_v45, %v1615_v28 }
  0xb4   : > { %v492_v55 = vadd.f32 %v491_v47, %v1617_v29  ;;  %v497_v56 = vadd.f32 %v496_v48, %v1619_v30  ;;  %v502_v57 = vadd.f32 %v501_v49, %v1621_v31 }
  0xb5   : > { %v507_v59 = vadd.f32 %v506_v51, %v1623_v32 }
  0xb6   : > { %v508_v60 = vadd.f32 %v492_v55, %v484_v46  ;;  %v509_v61 = vadd.f32 %v497_v56, %v485_v52  ;;  %v510_v62 = vadd.f32 %v502_v57, %v486_v53 }
  0xb7   : > { %v511_v63 = vadd.f32 %v507_v59, %v487_v54 }
  0xb8   : > { %512 = vst [vmem:[#allocation2] sm:$0xff] %v508_v60  ;;  %513 = vst [vmem:[#allocation2 + $0x8] sm:$0xff] %v509_v61 }
  0xb9   : > { %514 = vst [vmem:[#allocation2 + $0x10] sm:$0xff] %v510_v62  ;;  %515 = vst [vmem:[#allocation2 + $0x18] sm:$0xff] %v511_v63 }
  0xba PF: > { %p850_p5 = scmp.ge.s32.totalorder %s1482_s29, 192 }
  0xbb   : > { %v520_v0 = vlaneseq (!%p850_p5)  ;;  %v1655_v3 = vstv (!%p850_p5), %s1482_s29 }
  0xbc   : > { %519 = sbr.rel (%p850_p5) target bundleno = 224 (0xe0), region = 72 }
  0xbd   : > { %v1652_v2 = vshrl.u32 (!%p850_p5), %v520_v0, 7 }
  0xbf   : > { %v525_v4 = vadd.s32 (!%p850_p5), 32, %v1652_v2  ;;  %v529_v5 = vadd.s32 (!%p850_p5), 64, %v1652_v2  ;;  %v533_v6 = vadd.s32 (!%p850_p5), 96, %v1652_v2  ;;  %v537_v7 = vadd.s32 (!%p850_p5), 128, %v1652_v2  ;;  %v594_v49 = vld [vmem:[#allocation2] sm:$0xff] (!%p850_p5)  ;;  %v595_v61 = vld [vmem:[#allocation2 + $0x8] sm:$0xff] (!%p850_p5) }
  0xc0   : > { %v541_v9 = vadd.s32 (!%p850_p5), 160, %v1652_v2  ;;  %vm546_vm0 = vcmp.lt.s32.totalorder (!%p850_p5), %v1652_v2, %v1655_v3  ;;  %v522_v10 = vadd.s32 (!%p850_p5), 8, %v1652_v2  ;;  %v526_v11 = vadd.s32 (!%p850_p5), 40, %v1652_v2 }
  0xc1   : > { %vm550_vm1 = vcmp.lt.s32.totalorder (!%p850_p5), %v525_v4, %v1655_v3  ;;  %vm554_vm2 = vcmp.lt.s32.totalorder (!%p850_p5), %v529_v5, %v1655_v3  ;;  %vm558_vm3 = vcmp.lt.s32.totalorder (!%p850_p5), %v533_v6, %v1655_v3  ;;  %vm562_vm4 = vcmp.lt.s32.totalorder (!%p850_p5), %v537_v7, %v1655_v3 }
  0xc2   : > { %v570_v13 = vsel (!%p850_p5), %vm546_vm0, %v1551_v42, 0.0  ;;  %v574_v17 = vsel (!%p850_p5), %vm550_vm1, %v1585_v8, 0.0  ;;  %v578_v33 = vsel (!%p850_p5), %vm554_vm2, %v1593_v16, 0.0  ;;  %vm566_vm5 = vcmp.lt.s32.totalorder (!%p850_p5), %v541_v9, %v1655_v3 }
  0xc3   : > { %v582_v34 = vsel %vm558_vm3, %v1601_v21, 0.0  ;;  %v598_v35 = vadd.f32 %v574_v17, %v570_v13  ;;  %v530_v36 = vadd.s32 72, %v1652_v2  ;;  %v534_v37 = vadd.s32 104, %v1652_v2  ;;  %v596_v17 = vld [vmem:[#allocation2 + $0x10] sm:$0xff] }
  0xc4   : > { %v538_v38 = vadd.s32 136, %v1652_v2  ;;  %v542_v39 = vadd.s32 168, %v1652_v2  ;;  %v586_v40 = vsel %vm562_vm4, %v1609_v25, 0.0  ;;  %vm547_vm6 = vcmp.lt.s32.totalorder %v522_v10, %v1655_v3 }
  0xc5   : > { %v599_v42 = vadd.f32 %v598_v35, %v578_v33  ;;  %vm551_vm7 = vcmp.lt.s32.totalorder %v526_v11, %v1655_v3  ;;  %vm555_vm8 = vcmp.lt.s32.totalorder %v530_v36, %v1655_v3  ;;  %vm559_vm9 = vcmp.lt.s32.totalorder %v534_v37, %v1655_v3  ;;  %v597_v36 = vld [vmem:[#allocation2 + $0x18] sm:$0xff] }
  0xc6   : > { %vm563_vm10 = vcmp.lt.s32.totalorder %v538_v38, %v1655_v3  ;;  %v523_v8 = vadd.s32 16, %v1652_v2  ;;  %v571_v21 = vsel %vm547_vm6, %v1560_v50, 0.0  ;;  %v575_v41 = vsel %vm551_vm7, %v1587_v12, 0.0 }
  0xc7   : > { %v600_v16 = vadd.f32 %v599_v42, %v582_v34  ;;  %v579_v25 = vsel %vm555_vm8, %v1595_v18, 0.0  ;;  %v590_v43 = vsel %vm566_vm5, %v1617_v29, 0.0  ;;  %vm567_vm11 = vcmp.lt.s32.totalorder %v542_v39, %v1655_v3 }
  0xc8   : > { %v583_v44 = vsel %vm559_vm9, %v1603_v22, 0.0  ;;  %v603_v45 = vadd.f32 %v575_v41, %v571_v21  ;;  %v527_v47 = vadd.s32 48, %v1652_v2  ;;  %v531_v48 = vadd.s32 80, %v1652_v2 }
  0xc9   : > { %v601_v46 = vadd.f32 %v600_v16, %v586_v40  ;;  %v535_v50 = vadd.s32 112, %v1652_v2  ;;  %v587_v12 = vsel %vm563_vm10, %v1611_v26, 0.0  ;;  %v539_v51 = vadd.s32 144, %v1652_v2 }
  0xca   : > { %v604_v18 = vadd.f32 %v603_v45, %v579_v25  ;;  %vm548_vm12 = vcmp.lt.s32.totalorder %v523_v8, %v1655_v3  ;;  %vm552_vm13 = vcmp.lt.s32.totalorder %v527_v47, %v1655_v3  ;;  %vm556_vm14 = vcmp.lt.s32.totalorder %v531_v48, %v1655_v3 }
  0xcb   : > { %v602_v29 = vadd.f32 %v601_v46, %v590_v43  ;;  %vm560_vm15 = vcmp.lt.s32.totalorder %v535_v50, %v1655_v3  ;;  %v543_v52 = vadd.s32 176, %v1652_v2  ;;  %v572_v53 = vsel %vm548_vm12, %v1569_v58, 0.0 }
  0xcc   : > { %v605_v22 = vadd.f32 %v604_v18, %v583_v44  ;;  %v591_v26 = vsel %vm567_vm11, %v1619_v30, 0.0  ;;  %v576_v55 = vsel %vm552_vm13, %v1589_v14, 0.0  ;;  %v580_v56 = vsel %vm556_vm14, %v1597_v19, 0.0 }
  0xcd   : > { %v618_v54 = vadd.f32 %v602_v29, %v594_v49  ;;  %vm564_vm0 = vcmp.lt.s32.totalorder %v539_v51, %v1655_v3  ;;  %v584_v59 = vsel %vm560_vm15, %v1605_v23, 0.0  ;;  %v608_v60 = vadd.f32 %v576_v55, %v572_v53 }
  0xce   : > { %v606_v57 = vadd.f32 %v605_v22, %v587_v12  ;;  %v524_v62 = vadd.s32 24, %v1652_v2  ;;  %v528_v58 = vadd.s32 56, %v1652_v2  ;;  %v532_v63 = vadd.s32 88, %v1652_v2 }
  0xcf   : > { %622 = vst [vmem:[#allocation2] sm:$0xff] %v618_v54  ;;  %v536_v30 = vadd.s32 120, %v1652_v2  ;;  %vm568_vm1 = vcmp.lt.s32.totalorder %v543_v52, %v1655_v3  ;;  %v609_v14 = vadd.f32 %v608_v60, %v580_v56  ;;  %v540_v19 = vadd.s32 152, %v1652_v2 }
  0xd0   : > { %v607_v0 = vadd.f32 %v606_v57, %v591_v26  ;;  %v588_v4 = vsel %vm564_vm0, %v1613_v27, 0.0  ;;  %vm549_vm2 = vcmp.lt.s32.totalorder %v524_v62, %v1655_v3  ;;  %vm553_vm3 = vcmp.lt.s32.totalorder %v528_v58, %v1655_v3 }
  0xd1   : > { %vm557_vm4 = vcmp.lt.s32.totalorder %v532_v63, %v1655_v3  ;;  %v610_v5 = vadd.f32 %v609_v14, %v584_v59  ;;  %v544_v6 = vadd.s32 184, %v1652_v2  ;;  %vm561_vm5 = vcmp.lt.s32.totalorder %v536_v30, %v1655_v3 }
  0xd2   : > { %v619_v23 = vadd.f32 %v607_v0, %v595_v61  ;;  %v592_v7 = vsel %vm568_vm1, %v1621_v31, 0.0  ;;  %v573_v9 = vsel %vm549_vm2, %v1577_v1, 0.0  ;;  %v577_v10 = vsel %vm553_vm3, %v1591_v15, 0.0 }
  0xd3   : > { %v581_v27 = vsel %vm557_vm4, %v1599_v20, 0.0  ;;  %v611_v11 = vadd.f32 %v610_v5, %v588_v4  ;;  %vm565_vm6 = vcmp.lt.s32.totalorder %v540_v19, %v1655_v3  ;;  %v613_v13 = vadd.f32 %v577_v10, %v573_v9 }
  0xd4   : > { %623 = vst [vmem:[#allocation2 + $0x8] sm:$0xff] %v619_v23  ;;  %v585_v33 = vsel %vm561_vm5, %v1607_v24, 0.0  ;;  %vm569_vm7 = vcmp.lt.s32.totalorder %v544_v6, %v1655_v3  ;;  %v589_v31 = vsel %vm565_vm6, %v1615_v28, 0.0 }
  0xd5   : > { %v612_v34 = vadd.f32 %v611_v11, %v592_v7  ;;  %v614_v2 = vadd.f32 %v613_v13, %v581_v27  ;;  %v593_v15 = vsel %vm569_vm7, %v1623_v32, 0.0 }
  0xd7   : > { %v620_v35 = vadd.f32 %v612_v34, %v596_v17  ;;  %v615_v1 = vadd.f32 %v614_v2, %v585_v33 }
  0xd9   : > { %624 = vst [vmem:[#allocation2 + $0x10] sm:$0xff] %v620_v35  ;;  %v616_v20 = vadd.f32 %v615_v1, %v589_v31 }
  0xdb   : > { %v617_v37 = vadd.f32 %v616_v20, %v593_v15 }
  0xdd   : > { %v621_v38 = vadd.f32 %v617_v37, %v597_v36 }
  0xdf   : > { %625 = vst [vmem:[#allocation2 + $0x18] sm:$0xff] %v621_v38 }
  0xe0 PF: > { %v661_v39 = vld [vmem:[#allocation9] sm:$0xff]  ;;  %v629_v40 = vld [vmem:[#allocation2] sm:$0xff]  ;;  %v631_v8 = vld [vmem:[#allocation2 + $0x10] sm:$0xff]  ;;  %v685_v23 = vlaneseq  ;;  %p645_p3 = scmp.eq.s32.totalorder %s1206_s26, 0  ;;  %s852_s20 = sshll.u32 %s1206_s26, 7 }
  0xe1   : > { %v630_v24 = vld [vmem:[#allocation2 + $0x8] sm:$0xff]  ;;  %v662_v42 = vmul.f32 %v661_v39, %v661_v39  ;;  %v673_v28 = vld [vmem:[%s1808_s5] sm:$0xff]  ;;  %s717_s8 = sshll.u32 %s364_s18, 4  ;;  %s1746_s21 = scalar_lea.hbm %s1809_s6, %s852_s20  ;;  %s1748_s8 = int_to_ptr.vmem [resolvable:$true] %s717_s8 }
  0xe2   : > { %v633_v3 = vadd.f32 %v630_v24, %v629_v40  ;;  %v647_v21 = vld [vmem:[#allocation8] sm:$0xff]  ;;  %v674_v25 = vmul.f32 %v673_v28, %v673_v28  ;;  %v686_v5 = vshrl.u32 %v685_v23, 7  ;;  %s646_s4 = scalar_select %p645_p3, 1.0, 0.0 }
  0xe3   : > { %v648_v32 = vld [vmem:[%s1806_s3] sm:$0xff]  ;;  %663 = vadd.xlane.f32.xlu1 %v662_v42  ;;  %s704_s15 = scalar_lea.sflag [#allocation5], %s362_s9  ;;  %s1099_s26 = scalar_lea.vmem %s1748_s8, 128 }
  0xe4   : > { %v634_v41 = vadd.f32 %v633_v3, %v631_v8  ;;  %v649_v43 = vsub.f32 %v647_v21, %v648_v32  ;;  %vm687_vm8 = vcmp.eq.s32.totalorder %v686_v5, 0  ;;  %vm690_vm9 = vcmp.eq.s32.totalorder %v686_v5, 1  ;;  %p1100_p11 = scmp.ne.s32.totalorder %s1748_s8, %s1099_s26  ;;  %p1842_p7 = scmp.ne.s32.totalorder %s1825_s10, 0 }
  0xe5   : > { %vm694_vm10 = vcmp.eq.s32.totalorder %v686_v5, 2  ;;  %vm698_vm11 = vcmp.eq.s32.totalorder %v686_v5, 3  ;;  %s1223_s14 = smov [#allocation11]  }
  0xe6   : > { %v632_v16 = vld [vmem:[#allocation2 + $0x18] sm:$0xff]  ;;  %v650_v45 = vmul.f32 %v649_v43, %v649_v43  ;;  %p1101_p12 = pnand %p1100_p11, %p1842_p7  ;;  %s1103_s30 = sshll.u32 %s1223_s14, 4  ;;  %s1104_s30 = int_to_ptr.vmem [resolvable:$false] %s1103_s30 }
  0xe7   : > { %v635_v44 = vadd.f32 %v634_v41, %v632_v16  ;;  %675 = vadd.xlane.f32.xlu1 %v674_v25  ;;  %p1106_p1 = scmp.lt.s32.totalorder %s1748_s8, %s1104_s30 }
  0xe8   : > { %p1102_p0 = pneg %p1101_p12 }
  0xe9   : > { %636 = vadd.xlane.f32.xlu0 %v635_v44 }
  0xed   : > { %651 = vadd.xlane.f32.xlu0 %v650_v45 }
 0x170   : > { %v664_v46 = vpop.xlane.xlu1 %663 }
 0x171   : > { %v665_v47 = vrot.slane %v664_v46, 4 }
 0x173   : > { %v666_v48 = vadd.f32 %v665_v47, %v664_v46 }
 0x174   : > { %v676_v49 = vpop.xlane.xlu1 %675 }
 0x175   : > { %v677_v18 = vrot.slane %v676_v49, 4  ;;  %v667_v22 = vrot.slane %v666_v48, 2 }
 0x176   : > { %v637_v50 = vpop.xlane.xlu0 %636 }
 0x177   : > { %v638_v12 = vrot.slane %v637_v50, 4  ;;  %v678_v29 = vadd.f32 %v677_v18, %v676_v49  ;;  %v668_v57 = vadd.f32 %v667_v22, %v666_v48 }
 0x179   : > { %v639_v51 = vadd.f32 %v638_v12, %v637_v50  ;;  %v679_v54 = vrot.slane %v678_v29, 2  ;;  %v669_v63 = vrot.slane %v668_v57, 1 }
 0x17a   : > { %v652_v52 = vpop.xlane.xlu0 %651 }
 0x17b   : > { %v640_v53 = vrot.slane %v639_v51, 2  ;;  %v653_v26 = vrot.slane %v652_v52, 4  ;;  %v680_v59 = vadd.f32 %v679_v54, %v678_v29  ;;  %v670_v19 = vadd.f32 %v669_v63, %v668_v57 }
 0x17d   : > { %v654_v55 = vadd.f32 %v653_v26, %v652_v52  ;;  %v641_v56 = vadd.f32 %v640_v53, %v639_v51  ;;  %v681_v0 = vrot.slane %v680_v59, 1 }
 0x17f   : > { %v655_v60 = vrot.slane %v654_v55, 2  ;;  %v642_v61 = vrot.slane %v641_v56, 1  ;;  %v682_v4 = vadd.f32 %v681_v0, %v680_v59 }
 0x181   : > { %v656_v62 = vadd.f32 %v655_v60, %v654_v55  ;;  %v643_v58 = vadd.f32 %v642_v61, %v641_v56 }
 0x183   : > { %860 = vpush %v643_v58  ;;  %v657_v30 = vrot.slane %v656_v62, 1 }
 0x185   : > { %v658_v14 = vadd.f32 %v657_v30, %v656_v62 }
 0x187   : > { %862 = vpush %v658_v14 }
 0x188   : > { %864 = vpush %v670_v19 }
 0x189   : > { %866 = vpush %v682_v4 }
 0x1b4   : > { %s861_s2 = spop %860 }
 0x1b5   : > { %v688_v6 = vstv %s861_s2 }
 0x1b6   : > { %v689_v9 = vsel %vm687_vm8, %v688_v6, 0.0 }
 0x1b8   : > { %s863_s27 = spop %862 }
 0x1b9   : > { %s660_s7 = smul.f32 %s863_s27, %s646_s4  ;;  %s865_s13 = spop %864 }
 0x1ba   : > { %s672_s11 = smul.f32 %s865_s13, %s646_s4  ;;  %s867_s19 = spop %866 }
 0x1bb   : > { %v691_v7 = vstv %s660_s7  ;;  %s684_s16 = smul.f32 %s867_s19, %s646_s4  ;;  %s1105_s4 = scalar_lea.vmem %s1104_s30, 256 }
 0x1bc   : > { %v692_v10 = vsel %vm690_vm9, %v691_v7, 0.0  ;;  %v695_v27 = vstv %s672_s11  ;;  %p1107_p8 = scmp.lt.s32.totalorder %s1105_s4, %s1099_s26 }
 0x1bd   : > { %v693_v11 = vadd.f32 %v692_v10, %v689_v9  ;;  %v699_v13 = vstv %s684_s16  ;;  %v696_v17 = vsel %vm694_vm10, %v695_v27, 0.0 }
 0x1be   : > { %v700_v34 = vsel %vm698_vm11, %v699_v13, 0.0  ;;  %p1108_p10 = por %p1107_p8, %p1106_p1 }
 0x1bf   : > { %v697_v33 = vadd.f32 %v696_v17, %v693_v11 }
 0x1c0   : > { %p1109_p6 = pnand %p1108_p10, %p1102_p0 }
 0x1c1   : > { %v701_v2 = vadd.f32 %v700_v34, %v697_v33 }
 0x1c3   : > { %702 = vst [vmem:[%s364_s18] sm:$0xff] %v701_v2 }
 0x1c4   : > { %1112 = shalt.err (!%p1109_p6)
}
 0x1c5   : > { %s1113_s9 = scalar_lea.hbm %s1746_s21, 128  ;;  %s1117_s2 = scalar_lea.hbm %s1809_s6, 256 }
 0x1c6   : > { %p1114_p9 = scmp.ne.s32.totalorder %s1746_s21, %s1113_s9  ;;  %p1118_p4 = scmp.lt.u32.totalorder %s1746_s21, %s1809_s6 }
 0x1c7   : > { %p1119_p5 = scmp.lt.u32.totalorder %s1117_s2, %s1113_s9  ;;  %p1121_p11 = scmp.lt.u32.totalorder %s1113_s9, %s1746_s21 }
 0x1c8   : > { %p1115_p13 = pnand %p1114_p9, %p1842_p7 }
 0x1c9   : > { %p1120_p3 = por %p1119_p5, %p1118_p4 }
 0x1ca   : > { %p1116_p2 = pneg %p1115_p13 }
 0x1cb   : > { %p1122_p12 = por %p1121_p11, %p1120_p3 }
 0x1cd   : > { %p1123_p0 = pnand %p1122_p12, %p1116_p2 }
 0x1cf   : > { %1126 = shalt.err (!%p1123_p0)
}
 0x1d0   : > { %880 = dma.vmem_to_hbm [thread:$0]  (%p1842_p7), %s1748_s8, 128, %s1746_s21, %s704_s15  }
 0x1d1 PF: > { %s1843_s13 = sld [smem:[#allocation17_spill]]  ;;  %s1844_s11 = sld [smem:[#allocation19_spill]] }
 0x1d2   : > { %p1846_p8 = scmp.ge.s32.totalorder %s1214_s28, 2 }
 0x1d7   : > { %s729_s19 = sand.u32 1, %s1843_s13   ;;  %p1845_p1 = scmp.ne.s32.totalorder %s1844_s11, 0 }
 0x1d8   : > { %s730_s16 = scalar_lea.sflag [#allocation5], %s729_s19 }
 0x1d9   : > { %p897_p10 = pnand %p1846_p8, %p1845_p1 }
 0x1db   : > { %1180 = dma.done.wait (!%p897_p10), %s730_s16, 128  }
 0x1dc   : > { %1182 = vsyncadd (!%p897_p10), %s730_s16, 4294967168  ;;  %s26_s28 = sadd.s32 1, %s1214_s28   ;;  %s1847_s26 = sld [smem:[#allocation18_spill]] }
 0x1dd   : > { %p23_p6 = scmp.ge.s32.totalorder %s26_s28, 4   ;;  %s1848_s27 = sld [smem:[#allocation20_spill]] }
 0x1de   : > { %s1849_s21 = smov %s1190_s22  ;;  %s1850_s22 = smov %s1194_s23 }
 0x1df   : > { %s1851_s23 = smov %s1401_s24  ;;  %s1852_s24 = smov %s1202_s25 }
 0x1e0   : > { %s1793_s25 = smov 0   ;;  %25 = sbr.rel (!%p23_p6) target bundleno = 13 (0xd), region = 126 }
 0x1e7   :  { %735 = vsyncpa [#allocation4], 1 }
 0x1e8   :  { %737 = vsyncpa [#allocation4 + $0x1], 1 }
 0x1e9   :  { %738 = vsyncpa [#allocation7], 1 }
 0x1ea   :  { %740 = vsyncpa [#allocation7 + $0x1], 1 }
 0x1eb   :  { %741 = vsyncpa [#allocation10], 1 }
 0x1ec   :  { %742 = vsyncpa [#allocation5], 1 }
 0x1ed   :  { %744 = vsyncpa [#allocation5 + $0x1], 1 }

</bundles_post_ra>
